<compile_context>
chip_gen: v6e
topology: v6e:2x2x1
jax: 0.10.0
libtpu: 0.0.40
codegen_flags: <defaults>
</compile_context>

<pallas_src>
import functools

import jax
import jax.numpy as jnp
from jax.experimental import pallas as pl
from jax.experimental.pallas import tpu as pltpu

_LANES = 128


def _round_up(n, m):
    return (n + m - 1) // m * m


def _mlp_kernel(x_ref, w_ref, b_ref, o_ref, *, n_layers, approx_sigmoid):
    """Whole-MLP forward for one (batch_tile, 128) activation tile, all in VMEM.

    x_ref: (tile, D) in param dtype (f32 or bf16)
    w_ref: (L, D, D) packed transposed weights, param dtype
    b_ref: (L, 1, D) packed biases, f32
    o_ref: (tile, D) f32 lane-dense output slab (column 0 holds the real output)
    """
    h = x_ref[...]                                     # param dtype
    for l in range(n_layers):                          # static unroll: 5 layers
        z = jnp.dot(h.astype(w_ref.dtype), w_ref[l],
                    preferred_element_type=jnp.float32)
        z = z + b_ref[l]                               # f32 bias broadcast (1, D)
        if approx_sigmoid:
            # EUP exp + EUP approx reciprocal: keeps the divide off the VALU.
            h = pl.reciprocal(1.0 + jnp.exp(-z), approx=True)
        else:
            h = jax.nn.sigmoid(z)                      # exact f32 sigmoid
    o_ref[...] = h.astype(o_ref.dtype)


def mlp_forward(x, params, *, batch_tile=None, param_dtype=jnp.float32,
                approx_sigmoid=False):
    """Forward pass.

    params: list of 5 (W, b) pairs with PyTorch shapes W=(out, in), b=(out,).
    param_dtype: jnp.float32 everywhere, or jnp.bfloat16 for the v6e/v7x fast
        path (f32 accumulation is kept via preferred_element_type).
    """
    x = jnp.asarray(x, jnp.float32)
    B, d_in = x.shape
    n_layers = len(params)
    out_dim = params[-1][0].shape[0]

    # Common padded feature width (128 here: all dims <= 128).
    feat_dims = [d_in] + [w.shape[0] for (w, _) in params]
    D = _round_up(max(feat_dims), _LANES)

    # Pack weights (transposed to (in, out)) and biases into single stacked,
    # zero-padded, grid-invariant buffers: 3 inputs total instead of 11.
    W = jnp.zeros((n_layers, D, D), dtype=param_dtype)
    Bv = jnp.zeros((n_layers, 1, D), dtype=jnp.float32)
    for l, (w, b) in enumerate(params):
        w = jnp.asarray(w, jnp.float32)
        b = jnp.asarray(b, jnp.float32)
        o_d, i_d = w.shape
        W = W.at[l, :i_d, :o_d].set(w.T.astype(param_dtype))
        Bv = Bv.at[l, 0, :o_d].set(b)

    # Large batch tiles to amortise per-grid-step overhead.
    if batch_tile is None:
        batch_tile = min(512, _round_up(B, 8))
    batch_tile = max(8, _round_up(batch_tile, 8))
    B_pad = _round_up(B, batch_tile)

    # Lane-dense, zero-padded input slab. Padded rows/columns are inert because
    # the corresponding packed-weight rows are zero.
    x_p = jnp.zeros((B_pad, D), dtype=param_dtype)
    x_p = x_p.at[:B, :d_in].set(x.astype(param_dtype))

    grid = (B_pad // batch_tile,)
    kernel = functools.partial(_mlp_kernel, n_layers=n_layers,
                               approx_sigmoid=approx_sigmoid)

    out = pl.pallas_call(
        kernel,
        out_shape=jax.ShapeDtypeStruct((B_pad, D), jnp.float32),
        grid_spec=pltpu.PrefetchScalarGridSpec(
            num_scalar_prefetch=0,
            grid=grid,
            in_specs=[
                pl.BlockSpec((batch_tile, D), lambda i: (i, 0)),       # activations
                pl.BlockSpec((n_layers, D, D), lambda i: (0, 0, 0)),   # packed weights (resident)
                pl.BlockSpec((n_layers, 1, D), lambda i: (0, 0, 0)),   # packed biases  (resident)
            ],
            out_specs=pl.BlockSpec((batch_tile, D), lambda i: (i, 0)),  # lane-dense output slab
        ),
        compiler_params=pltpu.CompilerParams(
            dimension_semantics=("parallel",)),
    )(x_p, W, Bv)

    return out[:B, :out_dim]


def init_params(key, input_size, hidden=(50, 50, 50, 50), initial_bias=0.0,
                scale=None):
    """Init matching the module (weight ~ U[0,1), bias = initial_bias).

    scale='fanin' produces a zero-mean, ~1/sqrt(fan_in)-scaled variant that keeps
    the sigmoids out of saturation so the precision check is meaningful.
    """
    sizes = [input_size, *hidden, 1]
    params = []
    for i in range(len(sizes) - 1):
        key, sub = jax.random.split(key)
        w = jax.random.uniform(sub, (sizes[i + 1], sizes[i]), dtype=jnp.float32)  # U[0,1)
        if scale == "fanin":
            w = (w - 0.5) * (2.0 / jnp.sqrt(jnp.float32(sizes[i])))
        b = jnp.full((sizes[i + 1],), initial_bias, dtype=jnp.float32)
        params.append((w, b))
    return params


def mlp_reference(x, params):
    """Pure-JAX f32 reference for validation."""
    h = jnp.asarray(x, jnp.float32)
    for (w, b) in params:
        h = jax.nn.sigmoid(h @ jnp.asarray(w, jnp.float32).T
                           + jnp.asarray(b, jnp.float32))
    return h


if __name__ == "__main__":
    key = jax.random.PRNGKey(0)
    input_size = 8
    batch = 128  # matches config.batch_size

    kx, kp1, kp2 = jax.random.split(key, 3)
    x = jax.random.normal(kx, (batch, input_size), dtype=jnp.float32)

    # (a) module-faithful init (U[0,1) weights, zero bias) and
    # (b) non-saturating init that actually exercises precision.
    params_module = init_params(kp1, input_size)
    params_ns = init_params(kp2, input_size, scale="fanin")

    # f32 exact path: strict check. batch_tile=64 -> 2 "parallel" grid steps.
    for params in (params_module, params_ns):
        y = jax.block_until_ready(mlp_forward(x, params, batch_tile=64))
        y_ref = mlp_reference(x, params)
        assert y.shape == (batch, 1)
        assert jnp.allclose(y, y_ref, atol=1e-5, rtol=1e-5)

    # bf16 fast path (recommended on v6e/v7x; works everywhere): bf16 MXU inputs,
    # f32 accumulation, EUP approx-reciprocal sigmoid. Loose tolerance vs f32 ref.
    y_fast = jax.block_until_ready(
        mlp_forward(x, params_ns, batch_tile=64,
                    param_dtype=jnp.bfloat16, approx_sigmoid=True))
    y_ref = mlp_reference(x, params_ns)
    assert y_fast.shape == (batch, 1)
    assert jnp.allclose(y_fast, y_ref, atol=3e-2)

    print("KERNEL_OK")
</pallas_src>

<mosaic_0001>
module attributes {stable_mosaic.version = 11 : i64} {
  func.func @_mlp_kernel(%arg0: i32, %arg1: memref<64x128xf32, #tpu.memory_space<vmem>>, %arg2: memref<5x128x128xf32, #tpu.memory_space<vmem>>, %arg3: memref<5x1x128xf32, #tpu.memory_space<vmem>>, %arg4: memref<64x128xf32, #tpu.memory_space<vmem>>) attributes {dimension_semantics = [#tpu.dimension_semantics<parallel>], iteration_bounds = array<i64: 2>, scalar_prefetch = 0 : i64, scratch_operands = 0 : i64, tpu.core_type = #tpu.core_type<tc>, window_params = [{transform_indices = @transform_0, window_bounds = array<i64: 64, 128>}, {pipeline_mode = #tpu.pipeline_mode<synchronous>, transform_indices = @transform_1, window_bounds = array<i64: 5, 128, 128>}, {pipeline_mode = #tpu.pipeline_mode<synchronous>, transform_indices = @transform_2, window_bounds = array<i64: 5, 1, 128>}, {transform_indices = @transform_3, window_bounds = array<i64: 64, 128>}]} {
    %c0 = arith.constant 0 : index
    %c0_0 = arith.constant 0 : index
    %0 = vector.load %arg1[%c0, %c0_0] : memref<64x128xf32, #tpu.memory_space<vmem>>, vector<64x128xf32>
    %c0_1 = arith.constant 0 : index
    %c0_2 = arith.constant 0 : index
    %c0_3 = arith.constant 0 : index
    %1 = vector.load %arg2[%c0_1, %c0_2, %c0_3] : memref<5x128x128xf32, #tpu.memory_space<vmem>>, vector<1x128x128xf32>
    %2 = vector.shape_cast %1 : vector<1x128x128xf32> to vector<128x128xf32>
    %cst = arith.constant dense<0.000000e+00> : vector<64x128xf32>
    %3 = tpu.matmul %0, %2, %cst {dimension_numbers = #tpu.dot_dimension_numbers<[1], [0], [0], [1], [0, 0, 1, 1], [], []>} : vector<64x128xf32>, vector<128x128xf32>, vector<64x128xf32> -> vector<64x128xf32>
    %c0_4 = arith.constant 0 : index
    %c0_5 = arith.constant 0 : index
    %c0_6 = arith.constant 0 : index
    %4 = vector.load %arg3[%c0_4, %c0_5, %c0_6] : memref<5x1x128xf32, #tpu.memory_space<vmem>>, vector<1x1x128xf32>
    %5 = vector.shape_cast %4 : vector<1x1x128xf32> to vector<1x128xf32>
    %6 = vector.broadcast %5 : vector<1x128xf32> to vector<64x128xf32>
    %7 = arith.addf %3, %6 : vector<64x128xf32>
    %8 = arith.negf %7 : vector<64x128xf32>
    %9 = math.exp %8 : vector<64x128xf32>
    %cst_7 = arith.constant 1.000000e+00 : f32
    %10 = vector.broadcast %cst_7 : f32 to vector<64x128xf32>
    %11 = arith.addf %10, %9 : vector<64x128xf32>
    %12 = arith.divf %10, %11 : vector<64x128xf32>
    %c1 = arith.constant 1 : index
    %c0_8 = arith.constant 0 : index
    %c0_9 = arith.constant 0 : index
    %13 = vector.load %arg2[%c1, %c0_8, %c0_9] : memref<5x128x128xf32, #tpu.memory_space<vmem>>, vector<1x128x128xf32>
    %14 = vector.shape_cast %13 : vector<1x128x128xf32> to vector<128x128xf32>
    %cst_10 = arith.constant dense<0.000000e+00> : vector<64x128xf32>
    %15 = tpu.matmul %12, %14, %cst_10 {dimension_numbers = #tpu.dot_dimension_numbers<[1], [0], [0], [1], [0, 0, 1, 1], [], []>} : vector<64x128xf32>, vector<128x128xf32>, vector<64x128xf32> -> vector<64x128xf32>
    %c1_11 = arith.constant 1 : index
    %c0_12 = arith.constant 0 : index
    %c0_13 = arith.constant 0 : index
    %16 = vector.load %arg3[%c1_11, %c0_12, %c0_13] : memref<5x1x128xf32, #tpu.memory_space<vmem>>, vector<1x1x128xf32>
    %17 = vector.shape_cast %16 : vector<1x1x128xf32> to vector<1x128xf32>
    %18 = vector.broadcast %17 : vector<1x128xf32> to vector<64x128xf32>
    %19 = arith.addf %15, %18 : vector<64x128xf32>
    %20 = arith.negf %19 : vector<64x128xf32>
    %21 = math.exp %20 : vector<64x128xf32>
    %cst_14 = arith.constant 1.000000e+00 : f32
    %22 = vector.broadcast %cst_14 : f32 to vector<64x128xf32>
    %23 = arith.addf %22, %21 : vector<64x128xf32>
    %24 = arith.divf %22, %23 : vector<64x128xf32>
    %c2 = arith.constant 2 : index
    %c0_15 = arith.constant 0 : index
    %c0_16 = arith.constant 0 : index
    %25 = vector.load %arg2[%c2, %c0_15, %c0_16] : memref<5x128x128xf32, #tpu.memory_space<vmem>>, vector<1x128x128xf32>
    %26 = vector.shape_cast %25 : vector<1x128x128xf32> to vector<128x128xf32>
    %cst_17 = arith.constant dense<0.000000e+00> : vector<64x128xf32>
    %27 = tpu.matmul %24, %26, %cst_17 {dimension_numbers = #tpu.dot_dimension_numbers<[1], [0], [0], [1], [0, 0, 1, 1], [], []>} : vector<64x128xf32>, vector<128x128xf32>, vector<64x128xf32> -> vector<64x128xf32>
    %c2_18 = arith.constant 2 : index
    %c0_19 = arith.constant 0 : index
    %c0_20 = arith.constant 0 : index
    %28 = vector.load %arg3[%c2_18, %c0_19, %c0_20] : memref<5x1x128xf32, #tpu.memory_space<vmem>>, vector<1x1x128xf32>
    %29 = vector.shape_cast %28 : vector<1x1x128xf32> to vector<1x128xf32>
    %30 = vector.broadcast %29 : vector<1x128xf32> to vector<64x128xf32>
    %31 = arith.addf %27, %30 : vector<64x128xf32>
    %32 = arith.negf %31 : vector<64x128xf32>
    %33 = math.exp %32 : vector<64x128xf32>
    %cst_21 = arith.constant 1.000000e+00 : f32
    %34 = vector.broadcast %cst_21 : f32 to vector<64x128xf32>
    %35 = arith.addf %34, %33 : vector<64x128xf32>
    %36 = arith.divf %34, %35 : vector<64x128xf32>
    %c3 = arith.constant 3 : index
    %c0_22 = arith.constant 0 : index
    %c0_23 = arith.constant 0 : index
    %37 = vector.load %arg2[%c3, %c0_22, %c0_23] : memref<5x128x128xf32, #tpu.memory_space<vmem>>, vector<1x128x128xf32>
    %38 = vector.shape_cast %37 : vector<1x128x128xf32> to vector<128x128xf32>
    %cst_24 = arith.constant dense<0.000000e+00> : vector<64x128xf32>
    %39 = tpu.matmul %36, %38, %cst_24 {dimension_numbers = #tpu.dot_dimension_numbers<[1], [0], [0], [1], [0, 0, 1, 1], [], []>} : vector<64x128xf32>, vector<128x128xf32>, vector<64x128xf32> -> vector<64x128xf32>
    %c3_25 = arith.constant 3 : index
    %c0_26 = arith.constant 0 : index
    %c0_27 = arith.constant 0 : index
    %40 = vector.load %arg3[%c3_25, %c0_26, %c0_27] : memref<5x1x128xf32, #tpu.memory_space<vmem>>, vector<1x1x128xf32>
    %41 = vector.shape_cast %40 : vector<1x1x128xf32> to vector<1x128xf32>
    %42 = vector.broadcast %41 : vector<1x128xf32> to vector<64x128xf32>
    %43 = arith.addf %39, %42 : vector<64x128xf32>
    %44 = arith.negf %43 : vector<64x128xf32>
    %45 = math.exp %44 : vector<64x128xf32>
    %cst_28 = arith.constant 1.000000e+00 : f32
    %46 = vector.broadcast %cst_28 : f32 to vector<64x128xf32>
    %47 = arith.addf %46, %45 : vector<64x128xf32>
    %48 = arith.divf %46, %47 : vector<64x128xf32>
    %c4 = arith.constant 4 : index
    %c0_29 = arith.constant 0 : index
    %c0_30 = arith.constant 0 : index
    %49 = vector.load %arg2[%c4, %c0_29, %c0_30] : memref<5x128x128xf32, #tpu.memory_space<vmem>>, vector<1x128x128xf32>
    %50 = vector.shape_cast %49 : vector<1x128x128xf32> to vector<128x128xf32>
    %cst_31 = arith.constant dense<0.000000e+00> : vector<64x128xf32>
    %51 = tpu.matmul %48, %50, %cst_31 {dimension_numbers = #tpu.dot_dimension_numbers<[1], [0], [0], [1], [0, 0, 1, 1], [], []>} : vector<64x128xf32>, vector<128x128xf32>, vector<64x128xf32> -> vector<64x128xf32>
    %c4_32 = arith.constant 4 : index
    %c0_33 = arith.constant 0 : index
    %c0_34 = arith.constant 0 : index
    %52 = vector.load %arg3[%c4_32, %c0_33, %c0_34] : memref<5x1x128xf32, #tpu.memory_space<vmem>>, vector<1x1x128xf32>
    %53 = vector.shape_cast %52 : vector<1x1x128xf32> to vector<1x128xf32>
    %54 = vector.broadcast %53 : vector<1x128xf32> to vector<64x128xf32>
    %55 = arith.addf %51, %54 : vector<64x128xf32>
    %56 = arith.negf %55 : vector<64x128xf32>
    %57 = math.exp %56 : vector<64x128xf32>
    %cst_35 = arith.constant 1.000000e+00 : f32
    %58 = vector.broadcast %cst_35 : f32 to vector<64x128xf32>
    %59 = arith.addf %58, %57 : vector<64x128xf32>
    %60 = arith.divf %58, %59 : vector<64x128xf32>
    %c0_36 = arith.constant 0 : index
    %c0_37 = arith.constant 0 : index
    %61 = vector.load %arg4[%c0_36, %c0_37] : memref<64x128xf32, #tpu.memory_space<vmem>>, vector<64x128xf32>
    tpu.vector_store %arg4[%c0_36, %c0_37], %60 {strides = array<i32>} : memref<64x128xf32, #tpu.memory_space<vmem>>, vector<64x128xf32>,
    return
  }
  func.func @transform_0(%arg0: i32) -> (i32, i32) {
    %c0_i32 = arith.constant 0 : i32
    %c0_i32_0 = arith.constant 0 : i32
    return %arg0, %c0_i32 : i32, i32
  }
  func.func @transform_1(%arg0: i32) -> (i32, i32, i32) {
    %c0_i32 = arith.constant 0 : i32
    %c0_i32_0 = arith.constant 0 : i32
    %c0_i32_1 = arith.constant 0 : i32
    %c0_i32_2 = arith.constant 0 : i32
    return %c0_i32, %c0_i32_0, %c0_i32_1 : i32, i32, i32
  }
  func.func @transform_2(%arg0: i32) -> (i32, i32, i32) {
    %c0_i32 = arith.constant 0 : i32
    %c0_i32_0 = arith.constant 0 : i32
    %c0_i32_1 = arith.constant 0 : i32
    %c0_i32_2 = arith.constant 0 : i32
    return %c0_i32, %c0_i32_0, %c0_i32_1 : i32, i32, i32
  }
  func.func @transform_3(%arg0: i32) -> (i32, i32) {
    %c0_i32 = arith.constant 0 : i32
    %c0_i32_0 = arith.constant 0 : i32
    return %arg0, %c0_i32 : i32, i32
  }
}

</mosaic_0001>

<bundles_post_ra>
// kernel: tpu_custom_call.1
= control target key start
LH: loop header
LB: loop body
LE: loop exit
PB: predicated region body
PF: predicated region fallthrough
CT: control target
= control target key end

     0   :  { %8 = vsyncpa [#allocation3], 0  ;;  %s2296_s0 = inlined_call_operand.hbm [shape: f32[128,128], index: 0, kind: input, shape index: {}]   ;;  %s2297_s1 = inlined_call_operand.hbm [shape: f32[5,128,128], index: 1, kind: input, shape index: {}]   ;;  %s2298_s2 = inlined_call_operand.hbm [shape: f32[5,1,128], index: 2, kind: input, shape index: {}]   ;;  %s2299_s3 = inlined_call_operand.hbm [shape: f32[128,128], index: 3, kind: output, shape index: {}]  }
   0x1   :  { %10 = vsyncpa [#allocation3 + $0x1], 0 }
   0x2   :  { %11 = vsyncpa [#allocation6], 0 }
   0x3   :  { %12 = vsyncpa [#allocation4], 0 }
   0x4   :  { %14 = vsyncpa [#allocation4 + $0x1], 0  ;;  %s2080_s12 = smov 0   ;;  %s2082_s13 = smov 0  }
   0x5   :  { %s2084_s14 = smov 0   ;;  %s2086_s15 = smov 0  }
   0x6 LB: > { %s2101_s16 = sadd.s32 4294967295, %s2048_s15   ;;  %s1230_s17 = sadd.s32 4294967294, %s2048_s15   ;;  %s2048_s15 = sphi %s2086_s15, %s2320_s15   ;;  %s2044_s14 = sphi %s2084_s14, %s2319_s14   ;;  %s2040_s13 = sphi %s2082_s13, %s2318_s13   ;;  %s2036_s12 = sphi %s2080_s12, %s2317_s12  }
   0x7   : > { %p40_p0 = scmp.ne.s32.totalorder %s2040_s13, %s2036_s12  ;;  %p2300_p1 = scmp.eq.s32.totalorder %s2101_s16, 0 }
   0x8   : > { %p106_p2 = scmp.eq.s32.totalorder %s2101_s16, 1  ;;  %p112_p3 = scmp.eq.s32.totalorder %s1230_s17, 1 }
   0x9   : > { %p2110_p4 = por %p2300_p1, %p40_p0  ;;  %p1231_p5 = scmp.ge.s32.totalorder %s2048_s15, 1 }
   0xa   : > { %p2115_p6 = por %p112_p3, %p40_p0  ;;  %p119_p7 = scmp.lt.s32.totalorder %s2048_s15, 3 }
   0xb   : > { %s2304_s18 = scalar_select %p2110_p4, 1, 0 }
   0xc   : > { %s2305_s19 = scalar_select %p2115_p6, 1, 0 }
   0xd   : > { %p2120_p8 = pnand %p1231_p5, %p119_p7  ;;  %s2050_s21 = smov [#allocation5]  }
   0xe   : > { %s131_s22 = sshll.u32 %s2050_s21, 4  ;;  %s2051_s24 = smov [#allocation7]   ;;  %s132_s22 = int_to_ptr.vmem [resolvable:$true] %s131_s22 }
   0xf   : > { %s2306_s20 = scalar_select %p2120_p8, 1, 0 }
  0x10   : > { %p1679_p9 = pneg %p2120_p8  ;;  %s144_s25 = sshll.u32 %s2051_s24, 4  ;;  %s2133_s25 = int_to_ptr.vmem [resolvable:$true] %s144_s25 }
  0x11   : > { %s1911_s26 = scalar_lea.vmem %s132_s22, 10240  ;;  %p1919_p5 = scmp.lt.s32.totalorder %s132_s22, %s132_s22 }
  0x12   : > { %p2129_p11 = pnand %p1679_p9, %p2300_p1  ;;  %p1912_p13 = scmp.ne.s32.totalorder %s132_s22, %s1911_s26 }
  0x13   : > { %p1920_p7 = scmp.lt.s32.totalorder %s1911_s26, %s1911_s26 }
  0x14   : > { %p1902_p12 = pneg %p2129_p11 }
  0x15   : > { %p1921_p9 = por %p1920_p7, %p1919_p5 }
  0x16   : > { %p1914_p0 = pnand %p1912_p13, %p1902_p12 }
  0x18   : > { %p1915_p3 = pneg %p1914_p0 }
  0x1a   : > { %p1922_p10 = pnand %p1921_p9, %p1915_p3 }
  0x1c   : > { %1925 = shalt.err (!%p1922_p10)
}
  0x1d   : > { %s2052_s27 = smov 128   ;;  %s2053_s28 = smov 8  }
  0x1e   : > { %1682 = dma.hbm_to_vmem [thread:$0]  (!%p2129_p11), %s2297_s1, 10240, %s132_s22, [#allocation6], %s2052_s27, %s2052_s27, %s2053_s28  }
  0x1f   : > { %s1937_s4 = scalar_lea.vmem %s2133_s25, 80  ;;  %s1944_s5 = scalar_lea.vmem %s2133_s25, 96 }
  0x20   : > { %p1938_p13 = scmp.ne.s32.totalorder %s2133_s25, %s1937_s4  ;;  %p1945_p3 = scmp.lt.s32.totalorder %s2133_s25, %s2133_s25 }
  0x21   : > { %p1946_p5 = scmp.lt.s32.totalorder %s1944_s5, %s1937_s4 }
  0x22   : > { %p1940_p10 = pnand %p1938_p13, %p1902_p12 }
  0x23   : > { %p1947_p7 = por %p1946_p5, %p1945_p3 }
  0x24   : > { %p1941_p0 = pneg %p1940_p10 }
  0x26   : > { %p1948_p9 = pnand %p1947_p7, %p1941_p0 }
  0x28   : > { %1951 = shalt.err (!%p1948_p9)
}
  0x29   : > { %s2054_s6 = smov 16   ;;  %s2055_s7 = smov 1  }
  0x2a   : > { %1685 = dma.hbm_to_vmem [thread:$0]  (!%p2129_p11), %s2298_s2, 80, %s2133_s25, [#allocation6], %s2054_s6, %s2054_s6, %s2055_s7  }
  0x2b   : > { %s2163_s10 = sadd.s32 1, %s2048_s15   ;;  %s27_s17 = sadd.s32 1, %s2044_s14 }
  0x2c   : > { %s24_s11 = ssub.s32 %s2048_s15, %s2163_s10  ;;  %p34_p13 = scmp.ne.s32.totalorder %s2044_s14, %s2040_s13 }
  0x2d   : > { %p25_p12 = scmp.eq.s32.totalorder %s24_s11, 0  ;;  %p35_p10 = scmp.eq.s32.totalorder %s2048_s15, 0 }
  0x2e   : > { %p2176_p3 = por %p106_p2, %p34_p13  ;;  %p1696_p5 = scmp.lt.s32.totalorder %s2048_s15, 2 }
  0x2f   : > { %s2172_s21 = scalar_select %p25_p12, %s2044_s14, %s27_s17  }
  0x30   : > { %p36_p0 = por %p35_p10, %p34_p13  ;;  %s158_s23 = sand.u32 1, %s2044_s14  }
  0x31   : > { %s2308_s22 = scalar_select %p2176_p3, 1, 0 }
  0x32   : > { %s1235_s24 = sshll.u32 %s158_s23, 6  ;;  %s1293_s25 = sshll.u32 %s2048_s15, 10 }
  0x33   : > { %s2186_s30 = scalar_lea.hbm %s2296_s0, %s1293_s25  ;;  %s162_s4 = scalar_lea.vmem [#allocation2], %s1235_s24 }
  0x34   : > { %s169_s5 = sshll.u32 %s162_s4, 4  ;;  %p2190_p2 = pnand %p1696_p5, %p36_p0  ;;  %s2188_s5 = int_to_ptr.vmem [resolvable:$true] %s169_s5 }
  0x35   : > { %s2194_s7 = scalar_lea.sflag [#allocation3], %s158_s23  ;;  %s1952_s8 = scalar_lea.hbm %s2186_s30, 1024 }
  0x36   : > { %p1953_p11 = scmp.ne.s32.totalorder %s2186_s30, %s1952_s8  ;;  %p1954_p7 = pneg %p2190_p2 }
  0x37   : > { %s1957_s17 = scalar_lea.hbm %s2296_s0, 2048  ;;  %p1958_p13 = scmp.lt.s32.totalorder %s2186_s30, %s2296_s0 }
  0x38   : > { %p1955_p9 = pnand %p1954_p7, %p1953_p11  ;;  %p1959_p10 = scmp.lt.s32.totalorder %s1957_s17, %s1952_s8 }
  0x3a   : > { %p1956_p12 = pneg %p1955_p9  ;;  %p1960_p0 = por %p1959_p10, %p1958_p13 }
  0x3c   : > { %p1961_p5 = pnand %p1960_p0, %p1956_p12 }
  0x3e   : > { %1964 = shalt.err (!%p1961_p5)
}
  0x3f   : > { %s1965_s23 = scalar_lea.vmem %s2188_s5, 1024  ;;  %s2056_s26 = smov [#allocation2]  }
  0x40   : > { %p1966_p1 = scmp.ne.s32.totalorder %s2188_s5, %s1965_s23  ;;  %s1970_s29 = sshll.u32 %s2056_s26, 4  ;;  %s1971_s29 = int_to_ptr.vmem [resolvable:$false] %s1970_s29 }
  0x41   : > { %s1972_s4 = scalar_lea.vmem %s1971_s29, 2048  ;;  %p1973_p9 = scmp.lt.s32.totalorder %s2188_s5, %s1971_s29 }
  0x42   : > { %p1968_p6 = pnand %p1966_p1, %p1954_p7  ;;  %p1974_p3 = scmp.lt.s32.totalorder %s1972_s4, %s1965_s23 }
  0x44   : > { %p1969_p11 = pneg %p1968_p6  ;;  %p1975_p4 = por %p1974_p3, %p1973_p9 }
  0x46   : > { %p1976_p8 = pnand %p1975_p4, %p1969_p11 }
  0x48   : > { %1979 = shalt.err (!%p1976_p8)
}
  0x49   : > { %1689 = dma.hbm_to_vmem [thread:$0]  (!%p2190_p2), %s2186_s30, 1024, %s2188_s5, %s2194_s7, %s2052_s27, %s2052_s27, %s2053_s28  }
  0x4a   : > { %p2310_p1 = scmp.ne.s32.totalorder %s2306_s20, 0 }
  0x4b   : > { %s2221_s8 = sand.u32 (!%p2310_p1), 1, %s2040_s13   ;;  %p2311_p4 = scmp.ne.s32.totalorder (!%p2310_p1), %s2304_s18, 0 }
  0x4c   : > { %181 = sbr.rel (%p2310_p1) target bundleno = 1293 (0x50d), region = 32  ;;  %s1239_s9 = sshll.u32 (!%p2310_p1), %s2221_s8, 6 }
  0x4d   : > { %s184_s11 = scalar_lea.sflag (!%p2310_p1), [#allocation3], %s2221_s8  ;;  %s2227_s6 = scalar_lea.vmem (!%p2310_p1), [#allocation2], %s1239_s9 }
  0x51   : > { %2023 = dma.done.wait (%p2311_p4), %s184_s11, 1024  }
  0x52   : > { %2025 = vsyncadd (%p2311_p4), %s184_s11, 4294966272  ;;  %p2312_p6 = scmp.eq.s32.totalorder %s2101_s16, 0 }
  0x54   : > { %2027 = dma.done.wait (%p2312_p6), [#allocation6], 10320   ;;  %p2313_p8 = pmov %p2312_p6 }
  0x55   : > { %v243_v0 = vld [vmem:[#allocation5 + $0x78] sm:$0xff]  ;;  %v242_v1 = vld [vmem:[#allocation5 + $0x70] sm:$0xff]  ;;  %v241_v2 = vld [vmem:[#allocation5 + $0x68] sm:$0xff]  ;;  %s217_s18 = scalar_lea.vmem [#allocation8], %s1239_s9  ;;  %s1294_s20 = sshll.u32 %s2101_s16, 10 }
  0x56   : > { %2029 = vsyncadd (%p2313_p8), [#allocation6], 4294956976  ;;  %1415 = vmatprep.subr.mxu0 %v243_v0  ;;  %v240_v3 = vld [vmem:[#allocation5 + $0x60] sm:$0xff]  ;;  %v239_v5 = vld [vmem:[#allocation5 + $0x58] sm:$0xff]  ;;  %s1138_s27 = sshll.u32 %s217_s18, 4  ;;  %s2251_s5 = scalar_lea.hbm %s2299_s3, %s1294_s20  ;;  %s2253_s27 = int_to_ptr.vmem [resolvable:$true] %s1138_s27 }
  0x57   : > { %1416 = vmatpush3.msra.mxu0 %v243_v0  ;;  %v220_v4 = vld [vmem:[%s2227_s6] sm:$0xff]  ;;  %v238_v6 = vld [vmem:[#allocation5 + $0x50] sm:$0xff]  ;;  %v237_v7 = vld [vmem:[#allocation5 + $0x48] sm:$0xff]  ;;  %s1125_s7 = scalar_lea.sflag [#allocation4], %s2221_s8  ;;  %s1980_s17 = scalar_lea.vmem %s2253_s27, 1024 }
  0x58   : > { %1417 = vmatprep.subr.mxu0 %v242_v1  ;;  %1447 = vmatprep.mubr.f32.mxu0 %v220_v4  ;;  %v236_v8 = vld [vmem:[#allocation5 + $0x40] sm:$0xff]  ;;  %v235_v9 = vld [vmem:[#allocation5 + $0x38] sm:$0xff]  ;;  %v234_v10 = vld [vmem:[#allocation5 + $0x30] sm:$0xff]  ;;  %p1981_p3 = scmp.ne.s32.totalorder %s2253_s27, %s1980_s17  ;;  %p2314_p2 = scmp.ne.s32.totalorder %s2308_s22, 0 }
  0x59   : > { %1418 = vmatpush3.msra.mxu0 %v242_v1  ;;  %v233_v11 = vld [vmem:[#allocation5 + $0x28] sm:$0xff]  ;;  %v232_v12 = vld [vmem:[#allocation5 + $0x20] sm:$0xff]  ;;  %v231_v13 = vld [vmem:[#allocation5 + $0x18] sm:$0xff]  ;;  %s2057_s16 = smov [#allocation8]  }
  0x5a   : > { %1419 = vmatprep.subr.mxu0 %v241_v2  ;;  %v230_v14 = vld [vmem:[#allocation5 + $0x10] sm:$0xff]  ;;  %v229_v15 = vld [vmem:[#allocation5 + $0x8] sm:$0xff]  ;;  %v228_v16 = vld [vmem:[#allocation5] sm:$0xff]  ;;  %p1982_p7 = pnand %p1981_p3, %p2314_p2  ;;  %s1984_s24 = sshll.u32 %s2057_s16, 4  ;;  %s1985_s24 = int_to_ptr.vmem [resolvable:$false] %s1984_s24 }
  0x5b   : > { %1420 = vmatpush3.msra.mxu0 %v241_v2  ;;  %v221_v17 = vld [vmem:[%s2227_s6 + $0x8] sm:$0xff]  ;;  %v222_v18 = vld [vmem:[%s2227_s6 + $0x10] sm:$0xff]  ;;  %v223_v19 = vld [vmem:[%s2227_s6 + $0x18] sm:$0xff]  ;;  %s1986_s25 = scalar_lea.vmem %s1985_s24, 2048  ;;  %p1987_p13 = scmp.lt.s32.totalorder %s2253_s27, %s1985_s24 }
  0x5c   : > { %1421 = vmatprep.subr.mxu0 %v240_v3  ;;  %v224_v20 = vld [vmem:[%s2227_s6 + $0x20] sm:$0xff]  ;;  %v225_v21 = vld [vmem:[%s2227_s6 + $0x28] sm:$0xff]  ;;  %v226_v22 = vld [vmem:[%s2227_s6 + $0x30] sm:$0xff]  ;;  %p1983_p12 = pneg %p1982_p7  ;;  %p1988_p10 = scmp.lt.s32.totalorder %s1986_s25, %s1980_s17 }
  0x5d   : > { %1422 = vmatpush3.msra.mxu0 %v240_v3  ;;  %v227_v23 = vld [vmem:[%s2227_s6 + $0x38] sm:$0xff]  ;;  %v419_v25 = vld [vmem:[#allocation5 + $0xf0] sm:$0xff]  ;;  %v418_v26 = vld [vmem:[#allocation5 + $0xe8] sm:$0xff] }
  0x5e   : > { %1423 = vmatprep.subr.mxu0 %v239_v5  ;;  %v420_v24 = vld [vmem:[#allocation5 + $0xf8] sm:$0xff]  ;;  %v417_v27 = vld [vmem:[#allocation5 + $0xe0] sm:$0xff]  ;;  %v415_v29 = vld [vmem:[#allocation5 + $0xd0] sm:$0xff]  ;;  %p1989_p0 = por %p1988_p10, %p1987_p13 }
  0x5f   : > { %1424 = vmatpush3.msra.mxu0 %v239_v5  ;;  %1459 = vmatprep.subr.mxu1 %v420_v24  ;;  %v416_v28 = vld [vmem:[#allocation5 + $0xd8] sm:$0xff]  ;;  %v414_v30 = vld [vmem:[#allocation5 + $0xc8] sm:$0xff]  ;;  %v413_v31 = vld [vmem:[#allocation5 + $0xc0] sm:$0xff] }
  0x60   : > { %1425 = vmatprep.subr.mxu0 %v238_v6  ;;  %1460 = vmatpush3.msra.mxu1 %v420_v24  ;;  %v412_v32 = vld [vmem:[#allocation5 + $0xb8] sm:$0xff]  ;;  %v411_v33 = vld [vmem:[#allocation5 + $0xb0] sm:$0xff]  ;;  %v410_v34 = vld [vmem:[#allocation5 + $0xa8] sm:$0xff]  ;;  %p1990_p5 = pnand %p1989_p0, %p1983_p12 }
  0x61   : > { %1426 = vmatpush3.msra.mxu0 %v238_v6  ;;  %1461 = vmatprep.subr.mxu1 %v419_v25  ;;  %v409_v35 = vld [vmem:[#allocation5 + $0xa0] sm:$0xff]  ;;  %v408_v36 = vld [vmem:[#allocation5 + $0x98] sm:$0xff]  ;;  %v407_v37 = vld [vmem:[#allocation5 + $0x90] sm:$0xff] }
  0x62   : > { %1427 = vmatprep.subr.mxu0 %v237_v7  ;;  %1462 = vmatpush3.msra.mxu1 %v419_v25  ;;  %v406_v38 = vld [vmem:[#allocation5 + $0x88] sm:$0xff]  ;;  %v405_v39 = vld [vmem:[#allocation5 + $0x80] sm:$0xff]  ;;  %v598_v25 = vld [vmem:[#allocation5 + $0x178] sm:$0xff] }
  0x63   : > { %1428 = vmatpush3.msra.mxu0 %v237_v7  ;;  %1463 = vmatprep.subr.mxu1 %v418_v26  ;;  %v1243_v40 = vld [vmem:[#allocation7] ss:$0 sm:$0xff] }
  0x64   : > { %1429 = vmatprep.subr.mxu0 %v236_v8  ;;  %1464 = vmatpush3.msra.mxu1 %v418_v26  ;;  %v597_v26 = vld [vmem:[#allocation5 + $0x170] sm:$0xff] }
  0x65   : > { %1430 = vmatpush3.msra.mxu0 %v236_v8  ;;  %1465 = vmatprep.subr.mxu1 %v417_v27 }
  0x66   : > { %1431 = vmatprep.subr.mxu0 %v235_v9  ;;  %1466 = vmatpush3.msra.mxu1 %v417_v27  ;;  %v596_v27 = vld [vmem:[#allocation5 + $0x168] sm:$0xff] }
  0x67   : > { %1432 = vmatpush3.msra.mxu0 %v235_v9  ;;  %1467 = vmatprep.subr.mxu1 %v416_v28 }
  0x68   : > { %1433 = vmatprep.subr.mxu0 %v234_v10  ;;  %1468 = vmatpush3.msra.mxu1 %v416_v28  ;;  %v595_v28 = vld [vmem:[#allocation5 + $0x160] sm:$0xff] }
  0x69   : > { %1434 = vmatpush3.msra.mxu0 %v234_v10  ;;  %1469 = vmatprep.subr.mxu1 %v415_v29 }
  0x6a   : > { %1435 = vmatprep.subr.mxu0 %v233_v11  ;;  %1470 = vmatpush3.msra.mxu1 %v415_v29  ;;  %v594_v29 = vld [vmem:[#allocation5 + $0x158] sm:$0xff] }
  0x6b   : > { %1436 = vmatpush3.msra.mxu0 %v233_v11  ;;  %1471 = vmatprep.subr.mxu1 %v414_v30 }
  0x6c   : > { %1437 = vmatprep.subr.mxu0 %v232_v12  ;;  %1472 = vmatpush3.msra.mxu1 %v414_v30  ;;  %v593_v30 = vld [vmem:[#allocation5 + $0x150] sm:$0xff] }
  0x6d   : > { %1438 = vmatpush3.msra.mxu0 %v232_v12  ;;  %1473 = vmatprep.subr.mxu1 %v413_v31 }
  0x6e   : > { %1439 = vmatprep.subr.mxu0 %v231_v13  ;;  %1474 = vmatpush3.msra.mxu1 %v413_v31  ;;  %v592_v31 = vld [vmem:[#allocation5 + $0x148] sm:$0xff] }
  0x6f   : > { %1440 = vmatpush3.msra.mxu0 %v231_v13  ;;  %1475 = vmatprep.subr.mxu1 %v412_v32 }
  0x70   : > { %1441 = vmatprep.subr.mxu0 %v230_v14  ;;  %1476 = vmatpush3.msra.mxu1 %v412_v32  ;;  %v591_v32 = vld [vmem:[#allocation5 + $0x140] sm:$0xff] }
  0x71   : > { %1442 = vmatpush3.msra.mxu0 %v230_v14  ;;  %1477 = vmatprep.subr.mxu1 %v411_v33 }
  0x72   : > { %1443 = vmatprep.subr.mxu0 %v229_v15  ;;  %1478 = vmatpush3.msra.mxu1 %v411_v33  ;;  %v590_v33 = vld [vmem:[#allocation5 + $0x138] sm:$0xff] }
  0x73   : > { %1444 = vmatpush3.msra.mxu0 %v229_v15  ;;  %1479 = vmatprep.subr.mxu1 %v410_v34 }
  0x74   : > { %1445 = vmatprep.subr.mxu0 %v228_v16  ;;  %1480 = vmatpush3.msra.mxu1 %v410_v34  ;;  %v589_v34 = vld [vmem:[#allocation5 + $0x130] sm:$0xff] }
  0x75   : > { %1446 = vmatpush3.msra.mxu0 %v228_v16  ;;  %1481 = vmatprep.subr.mxu1 %v409_v35 }
  0x76   : > { %1448 = vmatmul.mubr.f32.vlgmr.msra.gmra.mxu0 %v221_v17  ;;  %1482 = vmatpush3.msra.mxu1 %v409_v35  ;;  %v588_v35 = vld [vmem:[#allocation5 + $0x128] sm:$0xff] }
  0x77   : > { %1450 = vmatprep.mubr.f32.mxu0 %v222_v18  ;;  %1483 = vmatprep.subr.mxu1 %v408_v36 }
  0x78   : > { %1484 = vmatpush3.msra.mxu1 %v408_v36  ;;  %1503 = vmatprep.subr.mxu0 %v598_v25  ;;  %v587_v36 = vld [vmem:[#allocation5 + $0x120] sm:$0xff] }
  0x79   : > { %1485 = vmatprep.subr.mxu1 %v407_v37  ;;  %1504 = vmatpush3.msra.mxu0 %v598_v25 }
  0x7a   : > { %1451 = vmatmul.mubr.f32.gmra.mxu0 %v223_v19  ;;  %1486 = vmatpush3.msra.mxu1 %v407_v37  ;;  %v586_v37 = vld [vmem:[#allocation5 + $0x118] sm:$0xff] }
  0x7b   : > { %1453 = vmatprep.mubr.f32.mxu0 %v224_v20  ;;  %1487 = vmatprep.subr.mxu1 %v406_v38 }
  0x7c   : > { %1488 = vmatpush3.msra.mxu1 %v406_v38  ;;  %1505 = vmatprep.subr.mxu0 %v597_v26  ;;  %v585_v38 = vld [vmem:[#allocation5 + $0x110] sm:$0xff] }
  0x7d   : > { %1489 = vmatprep.subr.mxu1 %v405_v39  ;;  %1506 = vmatpush3.msra.mxu0 %v597_v26  ;;  %v776_v26 = vld [vmem:[#allocation5 + $0x1f8] sm:$0xff] }
  0x7e   : > { %1454 = vmatmul.mubr.f32.gmra.mxu0 %v225_v21  ;;  %1490 = vmatpush3.msra.mxu1 %v405_v39  ;;  %v584_v39 = vld [vmem:[#allocation5 + $0x108] sm:$0xff] }
  0x7f   : > { %1456 = vmatprep.mubr.f32.mxu0 %v226_v22  ;;  %1507 = vmatprep.subr.mxu0 %v596_v27 }
  0x80   : > { %1508 = vmatpush3.msra.mxu0 %v596_v27  ;;  %1547 = vmatprep.subr.mxu1 %v776_v26  ;;  %v775_v27 = vld [vmem:[#allocation5 + $0x1f0] sm:$0xff] }
  0x81   : > { %1509 = vmatprep.subr.mxu0 %v595_v28 }
  0x82   : > { %1457 = vmatmul.mubr.f32.gmra.mxu0 %v227_v23 }
  0x83   : > { %1510 = vmatpush3.msra.mxu0 %v595_v28  ;;  %v774_v28 = vld [vmem:[#allocation5 + $0x1e8] sm:$0xff] }
  0x84   : > { %1511 = vmatprep.subr.mxu0 %v594_v29 }
  0x85   : > { %1512 = vmatpush3.msra.mxu0 %v594_v29  ;;  %v773_v29 = vld [vmem:[#allocation5 + $0x1e0] sm:$0xff] }
  0x86   : > { %1513 = vmatprep.subr.mxu0 %v593_v30 }
  0x87   : > { %1514 = vmatpush3.msra.mxu0 %v593_v30  ;;  %v772_v30 = vld [vmem:[#allocation5 + $0x1d8] sm:$0xff] }
  0x88   : > { %1515 = vmatprep.subr.mxu0 %v592_v31 }
  0x89   : > { %1516 = vmatpush3.msra.mxu0 %v592_v31  ;;  %v771_v31 = vld [vmem:[#allocation5 + $0x1d0] sm:$0xff] }
  0x8a   : > { %1517 = vmatprep.subr.mxu0 %v591_v32 }
  0x8b   : > { %1518 = vmatpush3.msra.mxu0 %v591_v32  ;;  %v770_v32 = vld [vmem:[#allocation5 + $0x1c8] sm:$0xff] }
  0x8c   : > { %1519 = vmatprep.subr.mxu0 %v590_v33 }
  0x8d   : > { %1520 = vmatpush3.msra.mxu0 %v590_v33  ;;  %v769_v33 = vld [vmem:[#allocation5 + $0x1c0] sm:$0xff] }
  0x8e   : > { %1521 = vmatprep.subr.mxu0 %v589_v34 }
  0x8f   : > { %1522 = vmatpush3.msra.mxu0 %v589_v34  ;;  %v768_v34 = vld [vmem:[#allocation5 + $0x1b8] sm:$0xff] }
  0x90   : > { %1523 = vmatprep.subr.mxu0 %v588_v35 }
  0x91   : > { %1524 = vmatpush3.msra.mxu0 %v588_v35  ;;  %v767_v35 = vld [vmem:[#allocation5 + $0x1b0] sm:$0xff] }
  0x92   : > { %1525 = vmatprep.subr.mxu0 %v587_v36 }
  0x93   : > { %1526 = vmatpush3.msra.mxu0 %v587_v36  ;;  %v766_v36 = vld [vmem:[#allocation5 + $0x1a8] sm:$0xff] }
  0x94   : > { %1527 = vmatprep.subr.mxu0 %v586_v37 }
  0x95   : > { %1528 = vmatpush3.msra.mxu0 %v586_v37  ;;  %v765_v37 = vld [vmem:[#allocation5 + $0x1a0] sm:$0xff] }
  0x96   : > { %1529 = vmatprep.subr.mxu0 %v585_v38 }
  0x97   : > { %1530 = vmatpush3.msra.mxu0 %v585_v38  ;;  %v764_v38 = vld [vmem:[#allocation5 + $0x198] sm:$0xff] }
  0x98   : > { %1531 = vmatprep.subr.mxu0 %v584_v39 }
  0x99   : > { %1532 = vmatpush3.msra.mxu0 %v584_v39  ;;  %v763_v39 = vld [vmem:[#allocation5 + $0x190] sm:$0xff] }
 0x136   : > { %v1449_v41 = vpop.f32.mrf.mxu0 }
 0x137   : > { %v323_v42 = vadd.f32 %v1449_v41, %v1243_v40  ;;  %v1252_v41 = vld [vmem:[#allocation7 + $0x1] ss:$0 sm:$0xff] }
 0x138   : > { %v317_v43 = vpop.f32.mrf.mxu0 }
 0x139   : > { %v1245_v44 = vmul.f32 -1.442695, %v323_v42  ;;  %v318_v45 = vadd.f32 %v1243_v40, %v317_v43 }
 0x13a   : > { %v1452_v46 = vpop.f32.mrf.mxu0 }
 0x13b   : > { %1740 = vpow2.f32 %v1245_v44  ;;  %v1244_v47 = vmul.f32 -1.442695, %v318_v45  ;;  %v333_v48 = vadd.f32 %v1452_v46, %v1243_v40 }
 0x13c   : > { %v327_v49 = vpop.f32.mrf.mxu0 }
 0x13d   : > { %1742 = vpow2.f32 %v1244_v47  ;;  %v1247_v50 = vmul.f32 -1.442695, %v333_v48  ;;  %v328_v51 = vadd.f32 %v1243_v40, %v327_v49 }
 0x13e   : > { %v1455_v52 = vpop.f32.mrf.mxu0 }
 0x13f   : > { %1744 = vpow2.f32 %v1247_v50  ;;  %v1246_v53 = vmul.f32 -1.442695, %v328_v51  ;;  %v343_v54 = vadd.f32 %v1455_v52, %v1243_v40 }
 0x140   : > { %v337_v55 = vpop.f32.mrf.mxu0 }
 0x141   : > { %1746 = vpow2.f32 %v1246_v53  ;;  %v1249_v56 = vmul.f32 -1.442695, %v343_v54  ;;  %v338_v57 = vadd.f32 %v1243_v40, %v337_v55 }
 0x142   : > { %v1458_v58 = vpop.f32.mrf.mxu0 }
 0x143   : > { %1748 = vpow2.f32 %v1249_v56  ;;  %v1248_v59 = vmul.f32 -1.442695, %v338_v57  ;;  %v353_v60 = vadd.f32 %v1458_v58, %v1243_v40 }
 0x144   : > { %v347_v61 = vpop.f32.mrf.mxu0 }
 0x145   : > { %1750 = vpow2.f32 %v1248_v59  ;;  %v1251_v62 = vmul.f32 -1.442695, %v353_v60  ;;  %v348_v63 = vadd.f32 %v1243_v40, %v347_v61  ;;  %v583_v40 = vld [vmem:[#allocation5 + $0x100] sm:$0xff] }
 0x146   : > { %1533 = vmatprep.subr.mxu0 %v583_v40 }
 0x147   : > { %1752 = vpow2.f32 %v1251_v62  ;;  %v1250_v0 = vmul.f32 -1.442695, %v348_v63  ;;  %1534 = vmatpush3.msra.mxu0 %v583_v40  ;;  %v762_v40 = vld [vmem:[#allocation5 + $0x188] sm:$0xff] }
 0x148   : > { %v1741_v1 = vpop.eup %1740 }
 0x149   : > { %1754 = vpow2.f32 %v1250_v0  ;;  %v381_v3 = vadd.f32 1.0, %v1741_v1 }
 0x14a   : > { %v1743_v2 = vpop.eup %1742 }
 0x14b   : > { %v380_v4 = vadd.f32 1.0, %v1743_v2 }
 0x14c   : > { %v1745_v5 = vpop.eup %1744 }
 0x14d   : > { %1756 = vrcp.f32 %v380_v4  ;;  %v383_v7 = vadd.f32 1.0, %v1745_v5 }
 0x14e   : > { %v1747_v6 = vpop.eup %1746  ;;  %1758 = vrcp.f32 %v381_v3 }
 0x14f   : > { %v382_v8 = vadd.f32 1.0, %v1747_v6 }
 0x150   : > { %v1749_v9 = vpop.eup %1748 }
 0x151   : > { %1760 = vrcp.f32 %v382_v8  ;;  %v385_v11 = vadd.f32 1.0, %v1749_v9 }
 0x152   : > { %v1751_v10 = vpop.eup %1750  ;;  %1762 = vrcp.f32 %v383_v7 }
 0x153   : > { %v384_v12 = vadd.f32 1.0, %v1751_v10 }
 0x154   : > { %v1753_v13 = vpop.eup %1752 }
 0x155   : > { %1764 = vrcp.f32 %v384_v12  ;;  %v387_v15 = vadd.f32 1.0, %v1753_v13 }
 0x156   : > { %v1755_v14 = vpop.eup %1754  ;;  %1766 = vrcp.f32 %v385_v11 }
 0x157   : > { %v386_v16 = vadd.f32 1.0, %v1755_v14 }
 0x159   : > { %1768 = vrcp.f32 %v386_v16 }
 0x15a   : > { %v1757_v17 = vpop.eup %1756  ;;  %1770 = vrcp.f32 %v387_v15 }
 0x15b   : > { %v1759_v18 = vpop.eup %1758  ;;  %1491 = vmatprep.mubr.f32.mxu1 %v1757_v17 }
 0x15c   : > { %1492 = vmatmul.mubr.f32.vlgmr.msra.gmra.mxu1 %v1759_v18 }
 0x15d   : > { %1548 = vmatpush3.msra.mxu1 %v776_v26 }
 0x15e   : > { %v1761_v19 = vpop.eup %1760  ;;  %1549 = vmatprep.subr.mxu1 %v775_v27 }
 0x15f   : > { %v1763_v20 = vpop.eup %1762  ;;  %1494 = vmatprep.mubr.f32.mxu1 %v1761_v19  ;;  %1550 = vmatpush3.msra.mxu1 %v775_v27  ;;  %v954_v27 = vld [vmem:[#allocation5 + $0x278] sm:$0xff] }
 0x160   : > { %1495 = vmatmul.mubr.f32.gmra.mxu1 %v1763_v20  ;;  %1551 = vmatprep.subr.mxu1 %v774_v28 }
 0x161   : > { %1552 = vmatpush3.msra.mxu1 %v774_v28  ;;  %1591 = vmatprep.subr.mxu0 %v954_v27  ;;  %v953_v28 = vld [vmem:[#allocation5 + $0x270] sm:$0xff] }
 0x162   : > { %v1765_v21 = vpop.eup %1764  ;;  %1553 = vmatprep.subr.mxu1 %v773_v29 }
 0x163   : > { %v1767_v22 = vpop.eup %1766  ;;  %1497 = vmatprep.mubr.f32.mxu1 %v1765_v21  ;;  %1554 = vmatpush3.msra.mxu1 %v773_v29  ;;  %v952_v29 = vld [vmem:[#allocation5 + $0x268] sm:$0xff] }
 0x164   : > { %1498 = vmatmul.mubr.f32.gmra.mxu1 %v1767_v22  ;;  %1555 = vmatprep.subr.mxu1 %v772_v30 }
 0x165   : > { %1556 = vmatpush3.msra.mxu1 %v772_v30  ;;  %v951_v30 = vld [vmem:[#allocation5 + $0x260] sm:$0xff] }
 0x166   : > { %v1769_v23 = vpop.eup %1768  ;;  %1557 = vmatprep.subr.mxu1 %v771_v31 }
 0x167   : > { %v1771_v24 = vpop.eup %1770  ;;  %1500 = vmatprep.mubr.f32.mxu1 %v1769_v23  ;;  %1558 = vmatpush3.msra.mxu1 %v771_v31  ;;  %v950_v31 = vld [vmem:[#allocation5 + $0x258] sm:$0xff] }
 0x168   : > { %1501 = vmatmul.mubr.f32.gmra.mxu1 %v1771_v24  ;;  %1559 = vmatprep.subr.mxu1 %v770_v32 }
 0x169   : > { %1560 = vmatpush3.msra.mxu1 %v770_v32  ;;  %v949_v32 = vld [vmem:[#allocation5 + $0x250] sm:$0xff] }
 0x16a   : > { %1561 = vmatprep.subr.mxu1 %v769_v33 }
 0x16b   : > { %1562 = vmatpush3.msra.mxu1 %v769_v33  ;;  %v948_v33 = vld [vmem:[#allocation5 + $0x248] sm:$0xff] }
 0x16c   : > { %1563 = vmatprep.subr.mxu1 %v768_v34 }
 0x16d   : > { %1564 = vmatpush3.msra.mxu1 %v768_v34  ;;  %v947_v34 = vld [vmem:[#allocation5 + $0x240] sm:$0xff] }
 0x16e   : > { %1565 = vmatprep.subr.mxu1 %v767_v35 }
 0x16f   : > { %1566 = vmatpush3.msra.mxu1 %v767_v35  ;;  %v946_v35 = vld [vmem:[#allocation5 + $0x238] sm:$0xff] }
 0x170   : > { %1567 = vmatprep.subr.mxu1 %v766_v36 }
 0x171   : > { %1568 = vmatpush3.msra.mxu1 %v766_v36  ;;  %v945_v36 = vld [vmem:[#allocation5 + $0x230] sm:$0xff] }
 0x172   : > { %1569 = vmatprep.subr.mxu1 %v765_v37 }
 0x173   : > { %1570 = vmatpush3.msra.mxu1 %v765_v37  ;;  %v944_v37 = vld [vmem:[#allocation5 + $0x228] sm:$0xff] }
 0x174   : > { %1571 = vmatprep.subr.mxu1 %v764_v38 }
 0x175   : > { %1572 = vmatpush3.msra.mxu1 %v764_v38  ;;  %v943_v38 = vld [vmem:[#allocation5 + $0x220] sm:$0xff] }
 0x176   : > { %1573 = vmatprep.subr.mxu1 %v763_v39 }
 0x177   : > { %1574 = vmatpush3.msra.mxu1 %v763_v39  ;;  %v942_v39 = vld [vmem:[#allocation5 + $0x218] sm:$0xff] }
 0x178   : > { %1575 = vmatprep.subr.mxu1 %v762_v40 }
 0x179   : > { %1576 = vmatpush3.msra.mxu1 %v762_v40  ;;  %v941_v40 = vld [vmem:[#allocation5 + $0x210] sm:$0xff] }
 0x21c   : > { %v1493_v42 = vpop.f32.mrf.mxu1 }
 0x21d   : > { %v501_v43 = vadd.f32 %v1493_v42, %v1252_v41  ;;  %v1261_v42 = vld [vmem:[#allocation7 + $0x2] ss:$0 sm:$0xff] }
 0x21e   : > { %v495_v44 = vpop.f32.mrf.mxu1 }
 0x21f   : > { %v1254_v45 = vmul.f32 -1.442695, %v501_v43  ;;  %v496_v46 = vadd.f32 %v1252_v41, %v495_v44 }
 0x220   : > { %v1496_v47 = vpop.f32.mrf.mxu1 }
 0x221   : > { %1772 = vpow2.f32 %v1254_v45  ;;  %v1253_v48 = vmul.f32 -1.442695, %v496_v46  ;;  %v511_v49 = vadd.f32 %v1496_v47, %v1252_v41 }
 0x222   : > { %v505_v50 = vpop.f32.mrf.mxu1 }
 0x223   : > { %1774 = vpow2.f32 %v1253_v48  ;;  %v1256_v51 = vmul.f32 -1.442695, %v511_v49  ;;  %v506_v52 = vadd.f32 %v1252_v41, %v505_v50 }
 0x224   : > { %v1499_v53 = vpop.f32.mrf.mxu1 }
 0x225   : > { %1776 = vpow2.f32 %v1256_v51  ;;  %v1255_v54 = vmul.f32 -1.442695, %v506_v52  ;;  %v521_v55 = vadd.f32 %v1499_v53, %v1252_v41 }
 0x226   : > { %v515_v56 = vpop.f32.mrf.mxu1 }
 0x227   : > { %1778 = vpow2.f32 %v1255_v54  ;;  %v1258_v57 = vmul.f32 -1.442695, %v521_v55  ;;  %v516_v58 = vadd.f32 %v1252_v41, %v515_v56 }
 0x228   : > { %v1502_v59 = vpop.f32.mrf.mxu1 }
 0x229   : > { %1780 = vpow2.f32 %v1258_v57  ;;  %v1257_v60 = vmul.f32 -1.442695, %v516_v58  ;;  %v531_v61 = vadd.f32 %v1502_v59, %v1252_v41 }
 0x22a   : > { %v525_v62 = vpop.f32.mrf.mxu1 }
 0x22b   : > { %1782 = vpow2.f32 %v1257_v60  ;;  %v1260_v63 = vmul.f32 -1.442695, %v531_v61  ;;  %v526_v0 = vadd.f32 %v1252_v41, %v525_v62  ;;  %v761_v41 = vld [vmem:[#allocation5 + $0x180] sm:$0xff] }
 0x22c   : > { %1577 = vmatprep.subr.mxu1 %v761_v41 }
 0x22d   : > { %1784 = vpow2.f32 %v1260_v63  ;;  %v1259_v1 = vmul.f32 -1.442695, %v526_v0  ;;  %1578 = vmatpush3.msra.mxu1 %v761_v41  ;;  %v940_v41 = vld [vmem:[#allocation5 + $0x208] sm:$0xff] }
 0x22e   : > { %v1773_v2 = vpop.eup %1772  ;;  %1635 = vmatprep.subr.mxu1 %v954_v27 }
 0x22f   : > { %1786 = vpow2.f32 %v1259_v1  ;;  %v559_v4 = vadd.f32 1.0, %v1773_v2 }
 0x230   : > { %v1775_v3 = vpop.eup %1774 }
 0x231   : > { %v558_v5 = vadd.f32 1.0, %v1775_v3 }
 0x232   : > { %v1777_v6 = vpop.eup %1776 }
 0x233   : > { %1788 = vrcp.f32 %v558_v5  ;;  %v561_v8 = vadd.f32 1.0, %v1777_v6 }
 0x234   : > { %v1779_v7 = vpop.eup %1778  ;;  %1790 = vrcp.f32 %v559_v4 }
 0x235   : > { %v560_v9 = vadd.f32 1.0, %v1779_v7 }
 0x236   : > { %v1781_v10 = vpop.eup %1780 }
 0x237   : > { %1792 = vrcp.f32 %v560_v9  ;;  %v563_v12 = vadd.f32 1.0, %v1781_v10 }
 0x238   : > { %v1783_v11 = vpop.eup %1782  ;;  %1794 = vrcp.f32 %v561_v8 }
 0x239   : > { %v562_v13 = vadd.f32 1.0, %v1783_v11 }
 0x23a   : > { %v1785_v14 = vpop.eup %1784 }
 0x23b   : > { %1796 = vrcp.f32 %v562_v13  ;;  %v565_v16 = vadd.f32 1.0, %v1785_v14 }
 0x23c   : > { %v1787_v15 = vpop.eup %1786  ;;  %1798 = vrcp.f32 %v563_v12 }
 0x23d   : > { %v564_v17 = vadd.f32 1.0, %v1787_v15 }
 0x23f   : > { %1800 = vrcp.f32 %v564_v17 }
 0x240   : > { %v1789_v18 = vpop.eup %1788  ;;  %1802 = vrcp.f32 %v565_v16 }
 0x241   : > { %v1791_v19 = vpop.eup %1790  ;;  %1535 = vmatprep.mubr.f32.mxu0 %v1789_v18 }
 0x242   : > { %1536 = vmatmul.mubr.f32.vlgmr.msra.gmra.mxu0 %v1791_v19 }
 0x243   : > { %1592 = vmatpush3.msra.mxu0 %v954_v27 }
 0x244   : > { %v1793_v20 = vpop.eup %1792  ;;  %1593 = vmatprep.subr.mxu0 %v953_v28 }
 0x245   : > { %v1795_v21 = vpop.eup %1794  ;;  %1538 = vmatprep.mubr.f32.mxu0 %v1793_v20  ;;  %1594 = vmatpush3.msra.mxu0 %v953_v28 }
 0x246   : > { %1539 = vmatmul.mubr.f32.gmra.mxu0 %v1795_v21  ;;  %1595 = vmatprep.subr.mxu0 %v952_v29 }
 0x247   : > { %1596 = vmatpush3.msra.mxu0 %v952_v29 }
 0x248   : > { %v1797_v22 = vpop.eup %1796  ;;  %1597 = vmatprep.subr.mxu0 %v951_v30 }
 0x249   : > { %v1799_v23 = vpop.eup %1798  ;;  %1541 = vmatprep.mubr.f32.mxu0 %v1797_v22  ;;  %1598 = vmatpush3.msra.mxu0 %v951_v30 }
 0x24a   : > { %1542 = vmatmul.mubr.f32.gmra.mxu0 %v1799_v23  ;;  %1599 = vmatprep.subr.mxu0 %v950_v31 }
 0x24b   : > { %1600 = vmatpush3.msra.mxu0 %v950_v31 }
 0x24c   : > { %v1801_v24 = vpop.eup %1800  ;;  %1601 = vmatprep.subr.mxu0 %v949_v32 }
 0x24d   : > { %v1803_v25 = vpop.eup %1802  ;;  %1544 = vmatprep.mubr.f32.mxu0 %v1801_v24  ;;  %1602 = vmatpush3.msra.mxu0 %v949_v32 }
 0x24e   : > { %1545 = vmatmul.mubr.f32.gmra.mxu0 %v1803_v25  ;;  %1603 = vmatprep.subr.mxu0 %v948_v33 }
 0x24f   : > { %1604 = vmatpush3.msra.mxu0 %v948_v33 }
 0x250   : > { %1605 = vmatprep.subr.mxu0 %v947_v34 }
 0x251   : > { %1606 = vmatpush3.msra.mxu0 %v947_v34 }
 0x252   : > { %1607 = vmatprep.subr.mxu0 %v946_v35 }
 0x253   : > { %1608 = vmatpush3.msra.mxu0 %v946_v35 }
 0x254   : > { %1609 = vmatprep.subr.mxu0 %v945_v36 }
 0x255   : > { %1610 = vmatpush3.msra.mxu0 %v945_v36 }
 0x256   : > { %1611 = vmatprep.subr.mxu0 %v944_v37 }
 0x257   : > { %1612 = vmatpush3.msra.mxu0 %v944_v37 }
 0x258   : > { %1613 = vmatprep.subr.mxu0 %v943_v38 }
 0x259   : > { %1614 = vmatpush3.msra.mxu0 %v943_v38 }
 0x25a   : > { %1615 = vmatprep.subr.mxu0 %v942_v39 }
 0x25b   : > { %1616 = vmatpush3.msra.mxu0 %v942_v39 }
 0x25c   : > { %1617 = vmatprep.subr.mxu0 %v941_v40 }
 0x25d   : > { %1618 = vmatpush3.msra.mxu0 %v941_v40 }
 0x25e   : > { %1619 = vmatprep.subr.mxu0 %v940_v41 }
 0x25f   : > { %1620 = vmatpush3.msra.mxu0 %v940_v41 }
 0x302   : > { %v1537_v43 = vpop.f32.mrf.mxu0 }
 0x303   : > { %v679_v44 = vadd.f32 %v1537_v43, %v1261_v42  ;;  %v1270_v43 = vld [vmem:[#allocation7 + $0x3] ss:$0 sm:$0xff] }
 0x304   : > { %v673_v45 = vpop.f32.mrf.mxu0 }
 0x305   : > { %v1263_v46 = vmul.f32 -1.442695, %v679_v44  ;;  %v674_v47 = vadd.f32 %v1261_v42, %v673_v45 }
 0x306   : > { %v1540_v48 = vpop.f32.mrf.mxu0 }
 0x307   : > { %1804 = vpow2.f32 %v1263_v46  ;;  %v1262_v49 = vmul.f32 -1.442695, %v674_v47  ;;  %v689_v50 = vadd.f32 %v1540_v48, %v1261_v42 }
 0x308   : > { %v683_v51 = vpop.f32.mrf.mxu0 }
 0x309   : > { %1806 = vpow2.f32 %v1262_v49  ;;  %v1265_v52 = vmul.f32 -1.442695, %v689_v50  ;;  %v684_v53 = vadd.f32 %v1261_v42, %v683_v51 }
 0x30a   : > { %v1543_v54 = vpop.f32.mrf.mxu0 }
 0x30b   : > { %1808 = vpow2.f32 %v1265_v52  ;;  %v1264_v55 = vmul.f32 -1.442695, %v684_v53  ;;  %v699_v56 = vadd.f32 %v1543_v54, %v1261_v42 }
 0x30c   : > { %v693_v57 = vpop.f32.mrf.mxu0 }
 0x30d   : > { %1810 = vpow2.f32 %v1264_v55  ;;  %v1267_v58 = vmul.f32 -1.442695, %v699_v56  ;;  %v694_v59 = vadd.f32 %v1261_v42, %v693_v57 }
 0x30e   : > { %v1546_v60 = vpop.f32.mrf.mxu0 }
 0x30f   : > { %1812 = vpow2.f32 %v1267_v58  ;;  %v1266_v61 = vmul.f32 -1.442695, %v694_v59  ;;  %v709_v62 = vadd.f32 %v1546_v60, %v1261_v42 }
 0x310   : > { %v703_v63 = vpop.f32.mrf.mxu0 }
 0x311   : > { %1814 = vpow2.f32 %v1266_v61  ;;  %v1269_v0 = vmul.f32 -1.442695, %v709_v62  ;;  %v704_v1 = vadd.f32 %v1261_v42, %v703_v63  ;;  %v939_v42 = vld [vmem:[#allocation5 + $0x200] sm:$0xff] }
 0x312   : > { %1621 = vmatprep.subr.mxu0 %v939_v42 }
 0x313   : > { %1816 = vpow2.f32 %v1269_v0  ;;  %v1268_v2 = vmul.f32 -1.442695, %v704_v1  ;;  %1622 = vmatpush3.msra.mxu0 %v939_v42 }
 0x314   : > { %v1805_v3 = vpop.eup %1804 }
 0x315   : > { %1818 = vpow2.f32 %v1268_v2  ;;  %v737_v5 = vadd.f32 1.0, %v1805_v3 }
 0x316   : > { %v1807_v4 = vpop.eup %1806 }
 0x317   : > { %v736_v6 = vadd.f32 1.0, %v1807_v4 }
 0x318   : > { %v1809_v7 = vpop.eup %1808 }
 0x319   : > { %1820 = vrcp.f32 %v736_v6  ;;  %v739_v9 = vadd.f32 1.0, %v1809_v7 }
 0x31a   : > { %v1811_v8 = vpop.eup %1810  ;;  %1822 = vrcp.f32 %v737_v5 }
 0x31b   : > { %v738_v10 = vadd.f32 1.0, %v1811_v8 }
 0x31c   : > { %v1813_v11 = vpop.eup %1812 }
 0x31d   : > { %1824 = vrcp.f32 %v738_v10  ;;  %v741_v13 = vadd.f32 1.0, %v1813_v11 }
 0x31e   : > { %v1815_v12 = vpop.eup %1814  ;;  %1826 = vrcp.f32 %v739_v9 }
 0x31f   : > { %v740_v14 = vadd.f32 1.0, %v1815_v12 }
 0x320   : > { %v1817_v15 = vpop.eup %1816 }
 0x321   : > { %1828 = vrcp.f32 %v740_v14  ;;  %v743_v17 = vadd.f32 1.0, %v1817_v15 }
 0x322   : > { %v1819_v16 = vpop.eup %1818  ;;  %1830 = vrcp.f32 %v741_v13 }
 0x323   : > { %v742_v18 = vadd.f32 1.0, %v1819_v16 }
 0x325   : > { %1832 = vrcp.f32 %v742_v18 }
 0x326   : > { %v1821_v19 = vpop.eup %1820  ;;  %1834 = vrcp.f32 %v743_v17 }
 0x327   : > { %v1823_v20 = vpop.eup %1822  ;;  %1579 = vmatprep.mubr.f32.mxu1 %v1821_v19 }
 0x328   : > { %1580 = vmatmul.mubr.f32.vlgmr.msra.gmra.mxu1 %v1823_v20 }
 0x329   : > { %1651 = vmatpush3.msra.mxu1 %v954_v27 }
 0x32a   : > { %v1825_v21 = vpop.eup %1824  ;;  %1636 = vmatprep.subr.mxu1 %v953_v28 }
 0x32b   : > { %v1827_v22 = vpop.eup %1826  ;;  %1582 = vmatprep.mubr.f32.mxu1 %v1825_v21  ;;  %1652 = vmatpush3.msra.mxu1 %v953_v28  ;;  %v1279_v28 = vld [vmem:[#allocation7 + $0x4] ss:$0 sm:$0xff] }
 0x32c   : > { %1583 = vmatmul.mubr.f32.gmra.mxu1 %v1827_v22  ;;  %1637 = vmatprep.subr.mxu1 %v952_v29 }
 0x32d   : > { %1653 = vmatpush3.msra.mxu1 %v952_v29 }
 0x32e   : > { %v1829_v23 = vpop.eup %1828  ;;  %1638 = vmatprep.subr.mxu1 %v951_v30 }
 0x32f   : > { %v1831_v24 = vpop.eup %1830  ;;  %1585 = vmatprep.mubr.f32.mxu1 %v1829_v23  ;;  %1654 = vmatpush3.msra.mxu1 %v951_v30 }
 0x330   : > { %1586 = vmatmul.mubr.f32.gmra.mxu1 %v1831_v24  ;;  %1639 = vmatprep.subr.mxu1 %v950_v31 }
 0x331   : > { %1655 = vmatpush3.msra.mxu1 %v950_v31 }
 0x332   : > { %v1833_v25 = vpop.eup %1832  ;;  %1640 = vmatprep.subr.mxu1 %v949_v32 }
 0x333   : > { %v1835_v26 = vpop.eup %1834  ;;  %1588 = vmatprep.mubr.f32.mxu1 %v1833_v25  ;;  %1656 = vmatpush3.msra.mxu1 %v949_v32 }
 0x334   : > { %1589 = vmatmul.mubr.f32.gmra.mxu1 %v1835_v26  ;;  %1641 = vmatprep.subr.mxu1 %v948_v33 }
 0x335   : > { %1657 = vmatpush3.msra.mxu1 %v948_v33 }
 0x336   : > { %1642 = vmatprep.subr.mxu1 %v947_v34 }
 0x337   : > { %1658 = vmatpush3.msra.mxu1 %v947_v34 }
 0x338   : > { %1643 = vmatprep.subr.mxu1 %v946_v35 }
 0x339   : > { %1659 = vmatpush3.msra.mxu1 %v946_v35 }
 0x33a   : > { %1644 = vmatprep.subr.mxu1 %v945_v36 }
 0x33b   : > { %1660 = vmatpush3.msra.mxu1 %v945_v36 }
 0x33c   : > { %1645 = vmatprep.subr.mxu1 %v944_v37 }
 0x33d   : > { %1661 = vmatpush3.msra.mxu1 %v944_v37 }
 0x33e   : > { %1646 = vmatprep.subr.mxu1 %v943_v38 }
 0x33f   : > { %1662 = vmatpush3.msra.mxu1 %v943_v38 }
 0x340   : > { %1647 = vmatprep.subr.mxu1 %v942_v39 }
 0x341   : > { %1663 = vmatpush3.msra.mxu1 %v942_v39 }
 0x342   : > { %1648 = vmatprep.subr.mxu1 %v941_v40 }
 0x343   : > { %1664 = vmatpush3.msra.mxu1 %v941_v40 }
 0x344   : > { %1649 = vmatprep.subr.mxu1 %v940_v41 }
 0x345   : > { %1665 = vmatpush3.msra.mxu1 %v940_v41 }
 0x346   : > { %1650 = vmatprep.subr.mxu1 %v939_v42 }
 0x347   : > { %1666 = vmatpush3.msra.mxu1 %v939_v42 }
 0x3e8   : > { %v1581_v44 = vpop.f32.mrf.mxu1 }
 0x3e9   : > { %v857_v45 = vadd.f32 %v1581_v44, %v1270_v43 }
 0x3ea   : > { %v851_v46 = vpop.f32.mrf.mxu1 }
 0x3eb   : > { %v1272_v47 = vmul.f32 -1.442695, %v857_v45  ;;  %v852_v48 = vadd.f32 %v1270_v43, %v851_v46 }
 0x3ec   : > { %v1584_v49 = vpop.f32.mrf.mxu1 }
 0x3ed   : > { %1836 = vpow2.f32 %v1272_v47  ;;  %v1271_v50 = vmul.f32 -1.442695, %v852_v48  ;;  %v867_v51 = vadd.f32 %v1584_v49, %v1270_v43 }
 0x3ee   : > { %v861_v52 = vpop.f32.mrf.mxu1 }
 0x3ef   : > { %1838 = vpow2.f32 %v1271_v50  ;;  %v1274_v53 = vmul.f32 -1.442695, %v867_v51  ;;  %v862_v54 = vadd.f32 %v1270_v43, %v861_v52 }
 0x3f0   : > { %v1587_v55 = vpop.f32.mrf.mxu1 }
 0x3f1   : > { %1840 = vpow2.f32 %v1274_v53  ;;  %v1273_v56 = vmul.f32 -1.442695, %v862_v54  ;;  %v877_v57 = vadd.f32 %v1587_v55, %v1270_v43 }
 0x3f2   : > { %v871_v58 = vpop.f32.mrf.mxu1 }
 0x3f3   : > { %1842 = vpow2.f32 %v1273_v56  ;;  %v1276_v59 = vmul.f32 -1.442695, %v877_v57  ;;  %v872_v60 = vadd.f32 %v1270_v43, %v871_v58 }
 0x3f4   : > { %v1590_v61 = vpop.f32.mrf.mxu1 }
 0x3f5   : > { %1844 = vpow2.f32 %v1276_v59  ;;  %v1275_v62 = vmul.f32 -1.442695, %v872_v60  ;;  %v887_v63 = vadd.f32 %v1590_v61, %v1270_v43 }
 0x3f6   : > { %v881_v0 = vpop.f32.mrf.mxu1 }
 0x3f7   : > { %1846 = vpow2.f32 %v1275_v62  ;;  %v1278_v1 = vmul.f32 -1.442695, %v887_v63  ;;  %v882_v2 = vadd.f32 %v1270_v43, %v881_v0 }
 0x3f9   : > { %1848 = vpow2.f32 %v1278_v1  ;;  %v1277_v3 = vmul.f32 -1.442695, %v882_v2 }
 0x3fa   : > { %v1837_v4 = vpop.eup %1836 }
 0x3fb   : > { %1850 = vpow2.f32 %v1277_v3  ;;  %v915_v6 = vadd.f32 1.0, %v1837_v4 }
 0x3fc   : > { %v1839_v5 = vpop.eup %1838 }
 0x3fd   : > { %v914_v7 = vadd.f32 1.0, %v1839_v5 }
 0x3fe   : > { %v1841_v8 = vpop.eup %1840 }
 0x3ff   : > { %1852 = vrcp.f32 %v914_v7  ;;  %v917_v10 = vadd.f32 1.0, %v1841_v8 }
 0x400   : > { %v1843_v9 = vpop.eup %1842  ;;  %1854 = vrcp.f32 %v915_v6 }
 0x401   : > { %v916_v11 = vadd.f32 1.0, %v1843_v9 }
 0x402   : > { %v1845_v12 = vpop.eup %1844 }
 0x403   : > { %1856 = vrcp.f32 %v916_v11  ;;  %v919_v14 = vadd.f32 1.0, %v1845_v12 }
 0x404   : > { %v1847_v13 = vpop.eup %1846  ;;  %1858 = vrcp.f32 %v917_v10 }
 0x405   : > { %v918_v15 = vadd.f32 1.0, %v1847_v13 }
 0x406   : > { %v1849_v16 = vpop.eup %1848 }
 0x407   : > { %1860 = vrcp.f32 %v918_v15  ;;  %v921_v18 = vadd.f32 1.0, %v1849_v16 }
 0x408   : > { %v1851_v17 = vpop.eup %1850  ;;  %1862 = vrcp.f32 %v919_v14 }
 0x409   : > { %v920_v19 = vadd.f32 1.0, %v1851_v17 }
 0x40b   : > { %1864 = vrcp.f32 %v920_v19 }
 0x40c   : > { %v1853_v20 = vpop.eup %1852  ;;  %1866 = vrcp.f32 %v921_v18 }
 0x40d   : > { %v1855_v21 = vpop.eup %1854  ;;  %1623 = vmatprep.mubr.f32.mxu0 %v1853_v20 }
 0x40e   : > { %1624 = vmatmul.mubr.f32.vlgmr.msra.gmra.mxu0 %v1855_v21 }
 0x410   : > { %v1857_v22 = vpop.eup %1856 }
 0x411   : > { %v1859_v23 = vpop.eup %1858  ;;  %1626 = vmatprep.mubr.f32.mxu0 %v1857_v22 }
 0x412   : > { %1627 = vmatmul.mubr.f32.gmra.mxu0 %v1859_v23 }
 0x414   : > { %v1861_v24 = vpop.eup %1860 }
 0x415   : > { %v1863_v25 = vpop.eup %1862  ;;  %1629 = vmatprep.mubr.f32.mxu1 %v1861_v24 }
 0x416   : > { %1630 = vmatmul.mubr.f32.vlgmr.msra.gmra.mxu1 %v1863_v25 }
 0x418   : > { %v1865_v26 = vpop.eup %1864 }
 0x419   : > { %v1867_v27 = vpop.eup %1866  ;;  %1632 = vmatprep.mubr.f32.mxu1 %v1865_v26 }
 0x41a   : > { %1633 = vmatmul.mubr.f32.gmra.mxu1 %v1867_v27 }
 0x4ce   : > { %v1625_v29 = vpop.f32.mrf.mxu0 }
 0x4cf   : > { %v1035_v30 = vadd.f32 %v1625_v29, %v1279_v28 }
 0x4d0   : > { %v1029_v31 = vpop.f32.mrf.mxu0 }
 0x4d1   : > { %v1281_v32 = vmul.f32 -1.442695, %v1035_v30  ;;  %v1030_v33 = vadd.f32 %v1279_v28, %v1029_v31 }
 0x4d2   : > { %v1628_v34 = vpop.f32.mrf.mxu0 }
 0x4d3   : > { %1868 = vpow2.f32 %v1281_v32  ;;  %v1280_v35 = vmul.f32 -1.442695, %v1030_v33  ;;  %v1045_v36 = vadd.f32 %v1628_v34, %v1279_v28 }
 0x4d4   : > { %v1039_v37 = vpop.f32.mrf.mxu0 }
 0x4d5   : > { %1870 = vpow2.f32 %v1280_v35  ;;  %v1283_v38 = vmul.f32 -1.442695, %v1045_v36  ;;  %v1040_v39 = vadd.f32 %v1279_v28, %v1039_v37 }
 0x4d6   : > { %v1631_v40 = vpop.f32.mrf.mxu1 }
 0x4d7   : > { %1872 = vpow2.f32 %v1283_v38  ;;  %v1282_v41 = vmul.f32 -1.442695, %v1040_v39  ;;  %v1055_v42 = vadd.f32 %v1631_v40, %v1279_v28 }
 0x4d8   : > { %v1049_v43 = vpop.f32.mrf.mxu1 }
 0x4d9   : > { %1874 = vpow2.f32 %v1282_v41  ;;  %v1285_v44 = vmul.f32 -1.442695, %v1055_v42  ;;  %v1050_v45 = vadd.f32 %v1279_v28, %v1049_v43 }
 0x4da   : > { %v1634_v46 = vpop.f32.mrf.mxu1 }
 0x4db   : > { %1876 = vpow2.f32 %v1285_v44  ;;  %v1284_v47 = vmul.f32 -1.442695, %v1050_v45  ;;  %v1065_v48 = vadd.f32 %v1634_v46, %v1279_v28 }
 0x4dc   : > { %v1059_v49 = vpop.f32.mrf.mxu1 }
 0x4dd   : > { %1878 = vpow2.f32 %v1284_v47  ;;  %v1287_v50 = vmul.f32 -1.442695, %v1065_v48  ;;  %v1060_v51 = vadd.f32 %v1279_v28, %v1059_v49 }
 0x4df   : > { %1880 = vpow2.f32 %v1287_v50  ;;  %v1286_v52 = vmul.f32 -1.442695, %v1060_v51 }
 0x4e0   : > { %v1869_v53 = vpop.eup %1868 }
 0x4e1   : > { %v1093_v54 = vadd.f32 1.0, %v1869_v53  ;;  %1882 = vpow2.f32 %v1286_v52 }
 0x4e2   : > { %v1871_v55 = vpop.eup %1870 }
 0x4e3   : > { %1884 = vrcp.f32 %v1093_v54  ;;  %v1092_v56 = vadd.f32 1.0, %v1871_v55 }
 0x4e4   : > { %v1873_v57 = vpop.eup %1872 }
 0x4e5   : > { %1886 = vrcp.f32 %v1092_v56  ;;  %v1095_v58 = vadd.f32 1.0, %v1873_v57 }
 0x4e6   : > { %v1875_v59 = vpop.eup %1874 }
 0x4e7   : > { %1888 = vrcp.f32 %v1095_v58  ;;  %v1094_v60 = vadd.f32 1.0, %v1875_v59 }
 0x4e8   : > { %v1877_v61 = vpop.eup %1876 }
 0x4e9   : > { %1890 = vrcp.f32 %v1094_v60  ;;  %v1097_v62 = vadd.f32 1.0, %v1877_v61 }
 0x4ea   : > { %v1879_v63 = vpop.eup %1878 }
 0x4eb   : > { %1892 = vrcp.f32 %v1097_v62  ;;  %v1096_v0 = vadd.f32 1.0, %v1879_v63 }
 0x4ec   : > { %v1881_v1 = vpop.eup %1880 }
 0x4ed   : > { %1894 = vrcp.f32 %v1096_v0  ;;  %v1099_v2 = vadd.f32 1.0, %v1881_v1 }
 0x4ee   : > { %v1883_v3 = vpop.eup %1882 }
 0x4ef   : > { %1896 = vrcp.f32 %v1099_v2  ;;  %v1098_v4 = vadd.f32 1.0, %v1883_v3 }
 0x4f0   : > { %v1885_v5 = vpop.eup %1884 }
 0x4f1   : > { %1117 = vst [vmem:[%s217_s18 + $0x8] sm:$0xff] %v1885_v5  ;;  %1898 = vrcp.f32 %v1098_v4 }
 0x4f2   : > { %v1887_v6 = vpop.eup %1886 }
 0x4f3   : > { %1116 = vst [vmem:[%s217_s18] sm:$0xff] %v1887_v6 }
 0x4f4   : > { %v1889_v7 = vpop.eup %1888 }
 0x4f5   : > { %1119 = vst [vmem:[%s217_s18 + $0x18] sm:$0xff] %v1889_v7 }
 0x4f6   : > { %v1891_v8 = vpop.eup %1890 }
 0x4f7   : > { %1118 = vst [vmem:[%s217_s18 + $0x10] sm:$0xff] %v1891_v8 }
 0x4f8   : > { %v1893_v9 = vpop.eup %1892 }
 0x4f9   : > { %1121 = vst [vmem:[%s217_s18 + $0x28] sm:$0xff] %v1893_v9 }
 0x4fa   : > { %v1895_v10 = vpop.eup %1894 }
 0x4fb   : > { %1120 = vst [vmem:[%s217_s18 + $0x20] sm:$0xff] %v1895_v10 }
 0x4fc   : > { %v1897_v11 = vpop.eup %1896 }
 0x4fd   : > { %1123 = vst [vmem:[%s217_s18 + $0x38] sm:$0xff] %v1897_v11 }
 0x4fe   : > { %v1899_v12 = vpop.eup %1898 }
 0x4ff   : > { %1122 = vst [vmem:[%s217_s18 + $0x30] sm:$0xff] %v1899_v12 }
 0x500   : > { %1993 = shalt.err (!%p1990_p5)
}
 0x501   : > { %s1994_s23 = scalar_lea.hbm %s2251_s5, 1024  ;;  %s1998_s4 = scalar_lea.hbm %s2299_s3, 2048 }
 0x502   : > { %p1995_p11 = scmp.ne.s32.totalorder %s2251_s5, %s1994_s23  ;;  %p1999_p4 = scmp.lt.s32.totalorder %s2251_s5, %s2299_s3 }
 0x503   : > { %p2000_p6 = scmp.lt.s32.totalorder %s1998_s4, %s1994_s23 }
 0x504   : > { %p1996_p9 = pnand %p1995_p11, %p2314_p2 }
 0x505   : > { %p2001_p8 = por %p2000_p6, %p1999_p4 }
 0x506   : > { %p1997_p1 = pneg %p1996_p9 }
 0x508   : > { %p2002_p3 = pnand %p2001_p8, %p1997_p1 }
 0x50a   : > { %2005 = shalt.err (!%p2002_p3)
}
 0x50b   : > { %s2058_s6 = smov 128   ;;  %s2059_s18 = smov 8  }
 0x50c   : > { %1677 = dma.vmem_to_hbm [thread:$0]  (%p2314_p2), %s2253_s27, 1024, %s2251_s5, %s1125_s7, %s2058_s6, %s2058_s6, %s2059_s18  }
 0x50d PF: > { %s1153_s20 = sand.u32 1, %s2036_s12   ;;  %p2315_p7 = scmp.ne.s32.totalorder %s2305_s19, 0 }
 0x50e   : > { %p2316_p12 = scmp.ge.s32.totalorder %s2048_s15, 2  ;;  %s1154_s28 = scalar_lea.sflag [#allocation4], %s1153_s20 }
 0x510   : > { %p1691_p13 = pnand %p2316_p12, %p2315_p7 }
 0x512   : > { %p1692_p10 = pneg %p1691_p13 }
 0x514   : > { %2031 = dma.done.wait (%p1692_p10), %s1154_s28, 1024  }
 0x515   : > { %2033 = vsyncadd (%p1692_p10), %s1154_s28, 4294966272  ;;  %p17_p0 = scmp.ge.s32.totalorder %s2163_s10, 4   ;;  %s2317_s12 = smov %s2040_s13 }
 0x516   : > { %s2318_s13 = smov %s2044_s14  ;;  %s2319_s14 = smov %s2172_s21 }
 0x517   : > { %s2320_s15 = smov %s2163_s10  ;;  %19 = sbr.rel (!%p17_p0) target bundleno = 6 (0x6), region = 93 }
 0x51c   :  { %1159 = vsyncpa [#allocation3], 1 }
 0x51d   :  { %1161 = vsyncpa [#allocation3 + $0x1], 1 }
 0x51e   :  { %1162 = vsyncpa [#allocation6], 1 }
 0x51f   :  { %1163 = vsyncpa [#allocation4], 1 }
 0x520   :  { %1165 = vsyncpa [#allocation4 + $0x1], 1 }

</bundles_post_ra>
